<compile_context>
chip_gen: v6e
topology: v6e:2x2x1
jax: 0.10.0
libtpu: 0.0.40
codegen_flags: <defaults>
</compile_context>

<pallas_src>
import functools

import jax
import jax.numpy as jnp
from jax.experimental import pallas as pl
from jax.experimental.pallas import tpu as pltpu


_TB_ALIGN = 256          # full MXU M-pass alignment on v6e/v7x (also /128 for v5e)
_LANE = 128              # lane width


def _round_up(x, m):
    return ((x + m - 1) // m) * m


# --------------------------------------------------------------------------
# Kernel: whole 4-layer MLP fused, one batch-tile per grid step.
# --------------------------------------------------------------------------
def _discriminator_kernel(x_ref,
                          w1_ref, b1_ref,
                          w2_ref, b2_ref,
                          w3_ref, b3_ref,
                          w4_ref, b4_ref,
                          o_ref, *, bf16_relu=True):
    cd = w1_ref.dtype                        # MXU input dtype (bf16)

    def relu(z):                             # z: f32 matmul-acc + bias
        if bf16_relu:                        # bf16 VALU on v6e/v7x: 2x elems/vreg
            return jnp.maximum(z.astype(cd), 0)
        return jnp.maximum(z, 0.0).astype(cd)

    x = x_ref[...].astype(cd)

    # layers 1..3: Linear (MXU, f32 accumulation) + bias + ReLU (VPU)
    h = relu(jnp.dot(x, w1_ref[...], preferred_element_type=jnp.float32) + b1_ref[...])
    h = relu(jnp.dot(h, w2_ref[...], preferred_element_type=jnp.float32) + b2_ref[...])
    h = relu(jnp.dot(h, w3_ref[...], preferred_element_type=jnp.float32) + b3_ref[...])

    # layer 4: Linear, then 2 * tanh (EUP); padded output columns are tanh(0)=0
    y = jnp.dot(h, w4_ref[...], preferred_element_type=jnp.float32) + b4_ref[...]
    o_ref[...] = (2.0 * jnp.tanh(y)).astype(o_ref.dtype)


# --------------------------------------------------------------------------
# Tile / VMEM sizing
# --------------------------------------------------------------------------
def _choose_batch_tile(B, F, Op, resident_bytes):
    """Pick batch-tile size TB and an explicit VMEM budget (bytes)."""
    try:
        vmem_cap = int(pltpu.get_tpu_info().vmem_capacity_bytes)
    except Exception:
        vmem_cap = 64 << 20                         # v7x per-core floor

    per_row = 2 * 4 * (F + Op)                      # double-buffered f32 in+out rows
    budget = int(0.70 * vmem_cap) - 2 * resident_bytes
    tb_cap = (max(budget, per_row * _TB_ALIGN) // per_row // _TB_ALIGN) * _TB_ALIGN
    tb_cap = int(min(max(tb_cap, _TB_ALIGN), 4096))

    if B <= tb_cap:
        if B > 2 * _TB_ALIGN:
            # >= 2 grid steps so the "parallel" batch axis can shard across the
            # two TensorCores on v7x (harmless on single-TC v5e/v6e).
            tb = min(_round_up(pl.cdiv(B, 2), _TB_ALIGN), tb_cap)
        elif B >= 16:
            tb = min(_round_up(B, 16), tb_cap)      # bf16 sublane pairs
        else:
            tb = _round_up(B, 8)                    # tiny batch: f32 sublanes
    else:
        tb = tb_cap

    needed = 2 * resident_bytes + tb * per_row
    vmem_limit = int(min(vmem_cap, max(needed + (8 << 20), 32 << 20)))
    return tb, vmem_limit


# --------------------------------------------------------------------------
# Wrapper
# --------------------------------------------------------------------------
def discriminator_forward(state, params, num_outputs, *, bf16_relu=True):
    """state: (B, num_inputs_full) f32.
    params: lane-padded dict w1..w4 (in, out_padded) bf16, b1..b4 (1, out_padded) f32;
    disc_obs_index selection is already folded into w1.  Returns (B, num_outputs) f32."""
    B, F = state.shape
    Op = params["w4"].shape[1]                      # lane-padded output width (x128)

    weight_args = (params["w1"], params["b1"],
                   params["w2"], params["b2"],
                   params["w3"], params["b3"],
                   params["w4"], params["b4"])
    resident_bytes = sum(int(a.size) * a.dtype.itemsize for a in weight_args)

    TB, vmem_limit = _choose_batch_tile(B, F, Op, resident_bytes)
    grid = (pl.cdiv(B, TB),)

    kernel = functools.partial(_discriminator_kernel, bf16_relu=bf16_relu)

    def _call(weight_pipeline_mode):
        def resident(a):
            # One full-extent block, constant index -> stays in VMEM across steps.
            kw = {}
            if weight_pipeline_mode is not None:
                kw["pipeline_mode"] = weight_pipeline_mode
            return pl.BlockSpec(a.shape, lambda i: (0,) * a.ndim, **kw)

        return pl.pallas_call(
            kernel,
            out_shape=jax.ShapeDtypeStruct((B, Op), jnp.float32),
            grid=grid,
            in_specs=[pl.BlockSpec((TB, F), lambda i: (i, 0))]
                     + [resident(a) for a in weight_args],
            out_specs=pl.BlockSpec((TB, Op), lambda i: (i, 0)),
            compiler_params=pltpu.CompilerParams(
                dimension_semantics=("parallel",),
                vmem_limit_bytes=vmem_limit),
        )(state, *weight_args)

    try:
        out = _call(pl.Buffered(1))                 # weights: single VMEM buffer
    except Exception:
        out = _call(None)                           # fallback: default buffering
    return out[:, :num_outputs]


# --------------------------------------------------------------------------
# Parameter init (matches torch: xavier_uniform_(gain=1), bias = 0)
# --------------------------------------------------------------------------
def _xavier_uniform(key, fan_in, fan_out, gain=1.0):
    limit = gain * jnp.sqrt(6.0 / (fan_in + fan_out))
    return jax.random.uniform(key, (fan_in, fan_out), jnp.float32, -limit, limit)


def init_discriminator_params(key, num_inputs_full, num_outputs, hidden_dim,
                              disc_obs_index=None, weight_dtype=jnp.bfloat16):
    """Returns (params_for_kernel, raw_params_for_reference).

    params_for_kernel: hidden and output dims zero-padded to multiples of 128
    lanes; the disc_obs_index gather is folded into W1 (zero rows for
    unselected features) so the kernel consumes the un-gathered state directly.
    """
    in_dim = len(disc_obs_index) if disc_obs_index is not None else num_inputs_full
    Hp = _round_up(hidden_dim, _LANE)
    Op = _round_up(num_outputs, _LANE)

    dims = [(in_dim, hidden_dim), (hidden_dim, hidden_dim),
            (hidden_dim, hidden_dim), (hidden_dim, num_outputs)]
    padded = [(num_inputs_full, Hp), (Hp, Hp), (Hp, Hp), (Hp, Op)]
    keys = jax.random.split(key, len(dims))

    raw, params = {}, {}
    for i, (k, (fi, fo), (pi, po)) in enumerate(zip(keys, dims, padded), start=1):
        w = _xavier_uniform(k, fi, fo)
        b = jnp.zeros((1, fo), jnp.float32)                  # constant_(bias, 0)
        raw[f"w{i}"], raw[f"b{i}"] = w.astype(weight_dtype), b

        wp = jnp.zeros((pi, po), jnp.float32)
        if i == 1 and disc_obs_index is not None:
            # Fold the gather into W1:  state[:, idx] @ W1 == state @ W1_scattered
            idx = jnp.asarray(disc_obs_index)
            wp = wp.at[idx, :fo].set(w)
        else:
            wp = wp.at[:fi, :fo].set(w)
        params[f"w{i}"] = wp.astype(weight_dtype)
        params[f"b{i}"] = jnp.zeros((1, po), jnp.float32).at[:, :fo].set(b)

    return params, raw


# --------------------------------------------------------------------------
# Pure-JAX reference (gather path, same bf16 operands, f32 accumulation)
# --------------------------------------------------------------------------
def _reference_forward(state, raw, disc_obs_index=None):
    x = state if disc_obs_index is None else state[:, jnp.asarray(disc_obs_index)]
    cd = raw["w1"].dtype

    def lin(x, w, b):
        return jnp.dot(x.astype(cd), w, preferred_element_type=jnp.float32) + b

    h = jax.nn.relu(lin(x, raw["w1"], raw["b1"]))
    h = jax.nn.relu(lin(h, raw["w2"], raw["b2"]))
    h = jax.nn.relu(lin(h, raw["w3"], raw["b3"]))
    y = lin(h, raw["w4"], raw["b4"])
    return 2.0 * jnp.tanh(y)


if __name__ == "__main__":
    key = jax.random.PRNGKey(0)
    k_param, k_state = jax.random.split(key)

    batch, num_inputs_full, num_outputs, hidden_dim = 8, 16, 4, 32
    disc_obs_index = [0, 2, 4, 5, 7, 9, 11, 13]        # select 8 of 16 features

    params, raw = init_discriminator_params(
        k_param, num_inputs_full, num_outputs, hidden_dim,
        disc_obs_index=disc_obs_index)
    state = jax.random.normal(k_state, (batch, num_inputs_full), jnp.float32)

    out = jax.block_until_ready(
        discriminator_forward(state, params, num_outputs))
    ref = _reference_forward(state, raw, disc_obs_index)

    assert out.shape == (batch, num_outputs)
    assert jnp.allclose(out, ref, atol=1e-2, rtol=1e-2), "mismatch vs reference"

    # Also exercise the no-index path.
    params2, raw2 = init_discriminator_params(
        k_param, num_inputs_full, num_outputs, hidden_dim, disc_obs_index=None)
    out2 = jax.block_until_ready(
        discriminator_forward(state, params2, num_outputs))
    ref2 = _reference_forward(state, raw2, None)
    assert out2.shape == (batch, num_outputs)
    assert jnp.allclose(out2, ref2, atol=1e-2, rtol=1e-2), "mismatch (no index)"

    print("KERNEL_OK")
</pallas_src>

<mosaic_0001>
module attributes {stable_mosaic.version = 11 : i64} {
  func.func @_discriminator_kernel(%arg0: i32, %arg1: memref<8x16xf32, #tpu.memory_space<vmem>>, %arg2: memref<16x128xbf16, #tpu.memory_space<vmem>>, %arg3: memref<1x128xf32, #tpu.memory_space<vmem>>, %arg4: memref<128x128xbf16, #tpu.memory_space<vmem>>, %arg5: memref<1x128xf32, #tpu.memory_space<vmem>>, %arg6: memref<128x128xbf16, #tpu.memory_space<vmem>>, %arg7: memref<1x128xf32, #tpu.memory_space<vmem>>, %arg8: memref<128x128xbf16, #tpu.memory_space<vmem>>, %arg9: memref<1x128xf32, #tpu.memory_space<vmem>>, %arg10: memref<8x128xf32, #tpu.memory_space<vmem>>) attributes {dimension_semantics = [#tpu.dimension_semantics<parallel>], iteration_bounds = array<i64: 1>, scalar_prefetch = 0 : i64, scratch_operands = 0 : i64, tpu.core_type = #tpu.core_type<tc>, window_params = [{transform_indices = @transform_0, window_bounds = array<i64: 8, 16>}, {pipeline_mode = #tpu.pipeline_mode<synchronous>, transform_indices = @transform_1, window_bounds = array<i64: 16, 128>}, {pipeline_mode = #tpu.pipeline_mode<synchronous>, transform_indices = @transform_2, window_bounds = array<i64: 1, 128>}, {pipeline_mode = #tpu.pipeline_mode<synchronous>, transform_indices = @transform_3, window_bounds = array<i64: 128, 128>}, {pipeline_mode = #tpu.pipeline_mode<synchronous>, transform_indices = @transform_4, window_bounds = array<i64: 1, 128>}, {pipeline_mode = #tpu.pipeline_mode<synchronous>, transform_indices = @transform_5, window_bounds = array<i64: 128, 128>}, {pipeline_mode = #tpu.pipeline_mode<synchronous>, transform_indices = @transform_6, window_bounds = array<i64: 1, 128>}, {pipeline_mode = #tpu.pipeline_mode<synchronous>, transform_indices = @transform_7, window_bounds = array<i64: 128, 128>}, {pipeline_mode = #tpu.pipeline_mode<synchronous>, transform_indices = @transform_8, window_bounds = array<i64: 1, 128>}, {transform_indices = @transform_9, window_bounds = array<i64: 8, 128>}]} {
    %c0 = arith.constant 0 : index
    %c0_0 = arith.constant 0 : index
    %0 = vector.load %arg1[%c0, %c0_0] : memref<8x16xf32, #tpu.memory_space<vmem>>, vector<8x16xf32>
    %1 = arith.truncf %0 : vector<8x16xf32> to vector<8x16xbf16>
    %c0_1 = arith.constant 0 : index
    %c0_2 = arith.constant 0 : index
    %2 = vector.load %arg2[%c0_1, %c0_2] : memref<16x128xbf16, #tpu.memory_space<vmem>>, vector<16x128xbf16>
    %cst = arith.constant dense<0.000000e+00> : vector<8x128xf32>
    %3 = tpu.matmul %1, %2, %cst {dimension_numbers = #tpu.dot_dimension_numbers<[1], [0], [0], [1], [0, 0, 1, 1], [], []>} : vector<8x16xbf16>, vector<16x128xbf16>, vector<8x128xf32> -> vector<8x128xf32>
    %c0_3 = arith.constant 0 : index
    %c0_4 = arith.constant 0 : index
    %4 = vector.load %arg3[%c0_3, %c0_4] : memref<1x128xf32, #tpu.memory_space<vmem>>, vector<1x128xf32>
    %5 = vector.broadcast %4 : vector<1x128xf32> to vector<8x128xf32>
    %6 = arith.addf %3, %5 : vector<8x128xf32>
    %7 = arith.truncf %6 : vector<8x128xf32> to vector<8x128xbf16>
    %cst_5 = arith.constant 0.000000e+00 : bf16
    %8 = vector.broadcast %cst_5 : bf16 to vector<8x128xbf16>
    %9 = arith.maximumf %7, %8 : vector<8x128xbf16>
    %c0_6 = arith.constant 0 : index
    %c0_7 = arith.constant 0 : index
    %10 = vector.load %arg4[%c0_6, %c0_7] : memref<128x128xbf16, #tpu.memory_space<vmem>>, vector<128x128xbf16>
    %cst_8 = arith.constant dense<0.000000e+00> : vector<8x128xf32>
    %11 = tpu.matmul %9, %10, %cst_8 {dimension_numbers = #tpu.dot_dimension_numbers<[1], [0], [0], [1], [0, 0, 1, 1], [], []>} : vector<8x128xbf16>, vector<128x128xbf16>, vector<8x128xf32> -> vector<8x128xf32>
    %c0_9 = arith.constant 0 : index
    %c0_10 = arith.constant 0 : index
    %12 = vector.load %arg5[%c0_9, %c0_10] : memref<1x128xf32, #tpu.memory_space<vmem>>, vector<1x128xf32>
    %13 = vector.broadcast %12 : vector<1x128xf32> to vector<8x128xf32>
    %14 = arith.addf %11, %13 : vector<8x128xf32>
    %15 = arith.truncf %14 : vector<8x128xf32> to vector<8x128xbf16>
    %cst_11 = arith.constant 0.000000e+00 : bf16
    %16 = vector.broadcast %cst_11 : bf16 to vector<8x128xbf16>
    %17 = arith.maximumf %15, %16 : vector<8x128xbf16>
    %c0_12 = arith.constant 0 : index
    %c0_13 = arith.constant 0 : index
    %18 = vector.load %arg6[%c0_12, %c0_13] : memref<128x128xbf16, #tpu.memory_space<vmem>>, vector<128x128xbf16>
    %cst_14 = arith.constant dense<0.000000e+00> : vector<8x128xf32>
    %19 = tpu.matmul %17, %18, %cst_14 {dimension_numbers = #tpu.dot_dimension_numbers<[1], [0], [0], [1], [0, 0, 1, 1], [], []>} : vector<8x128xbf16>, vector<128x128xbf16>, vector<8x128xf32> -> vector<8x128xf32>
    %c0_15 = arith.constant 0 : index
    %c0_16 = arith.constant 0 : index
    %20 = vector.load %arg7[%c0_15, %c0_16] : memref<1x128xf32, #tpu.memory_space<vmem>>, vector<1x128xf32>
    %21 = vector.broadcast %20 : vector<1x128xf32> to vector<8x128xf32>
    %22 = arith.addf %19, %21 : vector<8x128xf32>
    %23 = arith.truncf %22 : vector<8x128xf32> to vector<8x128xbf16>
    %cst_17 = arith.constant 0.000000e+00 : bf16
    %24 = vector.broadcast %cst_17 : bf16 to vector<8x128xbf16>
    %25 = arith.maximumf %23, %24 : vector<8x128xbf16>
    %c0_18 = arith.constant 0 : index
    %c0_19 = arith.constant 0 : index
    %26 = vector.load %arg8[%c0_18, %c0_19] : memref<128x128xbf16, #tpu.memory_space<vmem>>, vector<128x128xbf16>
    %cst_20 = arith.constant dense<0.000000e+00> : vector<8x128xf32>
    %27 = tpu.matmul %25, %26, %cst_20 {dimension_numbers = #tpu.dot_dimension_numbers<[1], [0], [0], [1], [0, 0, 1, 1], [], []>} : vector<8x128xbf16>, vector<128x128xbf16>, vector<8x128xf32> -> vector<8x128xf32>
    %c0_21 = arith.constant 0 : index
    %c0_22 = arith.constant 0 : index
    %28 = vector.load %arg9[%c0_21, %c0_22] : memref<1x128xf32, #tpu.memory_space<vmem>>, vector<1x128xf32>
    %29 = vector.broadcast %28 : vector<1x128xf32> to vector<8x128xf32>
    %30 = arith.addf %27, %29 : vector<8x128xf32>
    %31 = math.tanh %30 : vector<8x128xf32>
    %cst_23 = arith.constant 2.000000e+00 : f32
    %32 = vector.broadcast %cst_23 : f32 to vector<8x128xf32>
    %33 = arith.mulf %32, %31 : vector<8x128xf32>
    %c0_24 = arith.constant 0 : index
    %c0_25 = arith.constant 0 : index
    %34 = vector.load %arg10[%c0_24, %c0_25] : memref<8x128xf32, #tpu.memory_space<vmem>>, vector<8x128xf32>
    tpu.vector_store %arg10[%c0_24, %c0_25], %33 {strides = array<i32>} : memref<8x128xf32, #tpu.memory_space<vmem>>, vector<8x128xf32>,
    return
  }
  func.func @transform_0(%arg0: i32) -> (i32, i32) {
    %c0_i32 = arith.constant 0 : i32
    %c0_i32_0 = arith.constant 0 : i32
    return %arg0, %c0_i32 : i32, i32
  }
  func.func @transform_1(%arg0: i32) -> (i32, i32) {
    %c0_i32 = arith.constant 0 : i32
    %c0_i32_0 = arith.constant 0 : i32
    %c0_i32_1 = arith.constant 0 : i32
    return %c0_i32, %c0_i32_0 : i32, i32
  }
  func.func @transform_2(%arg0: i32) -> (i32, i32) {
    %c0_i32 = arith.constant 0 : i32
    %c0_i32_0 = arith.constant 0 : i32
    %c0_i32_1 = arith.constant 0 : i32
    return %c0_i32, %c0_i32_0 : i32, i32
  }
  func.func @transform_3(%arg0: i32) -> (i32, i32) {
    %c0_i32 = arith.constant 0 : i32
    %c0_i32_0 = arith.constant 0 : i32
    %c0_i32_1 = arith.constant 0 : i32
    return %c0_i32, %c0_i32_0 : i32, i32
  }
  func.func @transform_4(%arg0: i32) -> (i32, i32) {
    %c0_i32 = arith.constant 0 : i32
    %c0_i32_0 = arith.constant 0 : i32
    %c0_i32_1 = arith.constant 0 : i32
    return %c0_i32, %c0_i32_0 : i32, i32
  }
  func.func @transform_5(%arg0: i32) -> (i32, i32) {
    %c0_i32 = arith.constant 0 : i32
    %c0_i32_0 = arith.constant 0 : i32
    %c0_i32_1 = arith.constant 0 : i32
    return %c0_i32, %c0_i32_0 : i32, i32
  }
  func.func @transform_6(%arg0: i32) -> (i32, i32) {
    %c0_i32 = arith.constant 0 : i32
    %c0_i32_0 = arith.constant 0 : i32
    %c0_i32_1 = arith.constant 0 : i32
    return %c0_i32, %c0_i32_0 : i32, i32
  }
  func.func @transform_7(%arg0: i32) -> (i32, i32) {
    %c0_i32 = arith.constant 0 : i32
    %c0_i32_0 = arith.constant 0 : i32
    %c0_i32_1 = arith.constant 0 : i32
    return %c0_i32, %c0_i32_0 : i32, i32
  }
  func.func @transform_8(%arg0: i32) -> (i32, i32) {
    %c0_i32 = arith.constant 0 : i32
    %c0_i32_0 = arith.constant 0 : i32
    %c0_i32_1 = arith.constant 0 : i32
    return %c0_i32, %c0_i32_0 : i32, i32
  }
  func.func @transform_9(%arg0: i32) -> (i32, i32) {
    %c0_i32 = arith.constant 0 : i32
    %c0_i32_0 = arith.constant 0 : i32
    return %arg0, %c0_i32 : i32, i32
  }
}

module attributes {stable_mosaic.version = 11 : i64} {
  func.func @_discriminator_kernel(%arg0: i32, %arg1: memref<8x16xf32, #tpu.memory_space<vmem>>, %arg2: memref<16x128xbf16, #tpu.memory_space<vmem>>, %arg3: memref<1x128xf32, #tpu.memory_space<vmem>>, %arg4: memref<128x128xbf16, #tpu.memory_space<vmem>>, %arg5: memref<1x128xf32, #tpu.memory_space<vmem>>, %arg6: memref<128x128xbf16, #tpu.memory_space<vmem>>, %arg7: memref<1x128xf32, #tpu.memory_space<vmem>>, %arg8: memref<128x128xbf16, #tpu.memory_space<vmem>>, %arg9: memref<1x128xf32, #tpu.memory_space<vmem>>, %arg10: memref<8x128xf32, #tpu.memory_space<vmem>>) attributes {dimension_semantics = [#tpu.dimension_semantics<parallel>], iteration_bounds = array<i64: 1>, scalar_prefetch = 0 : i64, scratch_operands = 0 : i64, tpu.core_type = #tpu.core_type<tc>, window_params = [{transform_indices = @transform_0, window_bounds = array<i64: 8, 16>}, {pipeline_mode = #tpu.pipeline_mode<synchronous>, transform_indices = @transform_1, window_bounds = array<i64: 16, 128>}, {pipeline_mode = #tpu.pipeline_mode<synchronous>, transform_indices = @transform_2, window_bounds = array<i64: 1, 128>}, {pipeline_mode = #tpu.pipeline_mode<synchronous>, transform_indices = @transform_3, window_bounds = array<i64: 128, 128>}, {pipeline_mode = #tpu.pipeline_mode<synchronous>, transform_indices = @transform_4, window_bounds = array<i64: 1, 128>}, {pipeline_mode = #tpu.pipeline_mode<synchronous>, transform_indices = @transform_5, window_bounds = array<i64: 128, 128>}, {pipeline_mode = #tpu.pipeline_mode<synchronous>, transform_indices = @transform_6, window_bounds = array<i64: 1, 128>}, {pipeline_mode = #tpu.pipeline_mode<synchronous>, transform_indices = @transform_7, window_bounds = array<i64: 128, 128>}, {pipeline_mode = #tpu.pipeline_mode<synchronous>, transform_indices = @transform_8, window_bounds = array<i64: 1, 128>}, {transform_indices = @transform_9, window_bounds = array<i64: 8, 128>}]} {
    %c0 = arith.constant 0 : index
    %c0_0 = arith.constant 0 : index
    %0 = vector.load %arg1[%c0, %c0_0] : memref<8x16xf32, #tpu.memory_space<vmem>>, vector<8x16xf32>
    %1 = arith.truncf %0 : vector<8x16xf32> to vector<8x16xbf16>
    %c0_1 = arith.constant 0 : index
    %c0_2 = arith.constant 0 : index
    %2 = vector.load %arg2[%c0_1, %c0_2] : memref<16x128xbf16, #tpu.memory_space<vmem>>, vector<16x128xbf16>
    %cst = arith.constant dense<0.000000e+00> : vector<8x128xf32>
    %3 = tpu.matmul %1, %2, %cst {dimension_numbers = #tpu.dot_dimension_numbers<[1], [0], [0], [1], [0, 0, 1, 1], [], []>} : vector<8x16xbf16>, vector<16x128xbf16>, vector<8x128xf32> -> vector<8x128xf32>
    %c0_3 = arith.constant 0 : index
    %c0_4 = arith.constant 0 : index
    %4 = vector.load %arg3[%c0_3, %c0_4] : memref<1x128xf32, #tpu.memory_space<vmem>>, vector<1x128xf32>
    %5 = vector.broadcast %4 : vector<1x128xf32> to vector<8x128xf32>
    %6 = arith.addf %3, %5 : vector<8x128xf32>
    %7 = arith.truncf %6 : vector<8x128xf32> to vector<8x128xbf16>
    %cst_5 = arith.constant 0.000000e+00 : bf16
    %8 = vector.broadcast %cst_5 : bf16 to vector<8x128xbf16>
    %9 = arith.maximumf %7, %8 : vector<8x128xbf16>
    %c0_6 = arith.constant 0 : index
    %c0_7 = arith.constant 0 : index
    %10 = vector.load %arg4[%c0_6, %c0_7] : memref<128x128xbf16, #tpu.memory_space<vmem>>, vector<128x128xbf16>
    %cst_8 = arith.constant dense<0.000000e+00> : vector<8x128xf32>
    %11 = tpu.matmul %9, %10, %cst_8 {dimension_numbers = #tpu.dot_dimension_numbers<[1], [0], [0], [1], [0, 0, 1, 1], [], []>} : vector<8x128xbf16>, vector<128x128xbf16>, vector<8x128xf32> -> vector<8x128xf32>
    %c0_9 = arith.constant 0 : index
    %c0_10 = arith.constant 0 : index
    %12 = vector.load %arg5[%c0_9, %c0_10] : memref<1x128xf32, #tpu.memory_space<vmem>>, vector<1x128xf32>
    %13 = vector.broadcast %12 : vector<1x128xf32> to vector<8x128xf32>
    %14 = arith.addf %11, %13 : vector<8x128xf32>
    %15 = arith.truncf %14 : vector<8x128xf32> to vector<8x128xbf16>
    %cst_11 = arith.constant 0.000000e+00 : bf16
    %16 = vector.broadcast %cst_11 : bf16 to vector<8x128xbf16>
    %17 = arith.maximumf %15, %16 : vector<8x128xbf16>
    %c0_12 = arith.constant 0 : index
    %c0_13 = arith.constant 0 : index
    %18 = vector.load %arg6[%c0_12, %c0_13] : memref<128x128xbf16, #tpu.memory_space<vmem>>, vector<128x128xbf16>
    %cst_14 = arith.constant dense<0.000000e+00> : vector<8x128xf32>
    %19 = tpu.matmul %17, %18, %cst_14 {dimension_numbers = #tpu.dot_dimension_numbers<[1], [0], [0], [1], [0, 0, 1, 1], [], []>} : vector<8x128xbf16>, vector<128x128xbf16>, vector<8x128xf32> -> vector<8x128xf32>
    %c0_15 = arith.constant 0 : index
    %c0_16 = arith.constant 0 : index
    %20 = vector.load %arg7[%c0_15, %c0_16] : memref<1x128xf32, #tpu.memory_space<vmem>>, vector<1x128xf32>
    %21 = vector.broadcast %20 : vector<1x128xf32> to vector<8x128xf32>
    %22 = arith.addf %19, %21 : vector<8x128xf32>
    %23 = arith.truncf %22 : vector<8x128xf32> to vector<8x128xbf16>
    %cst_17 = arith.constant 0.000000e+00 : bf16
    %24 = vector.broadcast %cst_17 : bf16 to vector<8x128xbf16>
    %25 = arith.maximumf %23, %24 : vector<8x128xbf16>
    %c0_18 = arith.constant 0 : index
    %c0_19 = arith.constant 0 : index
    %26 = vector.load %arg8[%c0_18, %c0_19] : memref<128x128xbf16, #tpu.memory_space<vmem>>, vector<128x128xbf16>
    %cst_20 = arith.constant dense<0.000000e+00> : vector<8x128xf32>
    %27 = tpu.matmul %25, %26, %cst_20 {dimension_numbers = #tpu.dot_dimension_numbers<[1], [0], [0], [1], [0, 0, 1, 1], [], []>} : vector<8x128xbf16>, vector<128x128xbf16>, vector<8x128xf32> -> vector<8x128xf32>
    %c0_21 = arith.constant 0 : index
    %c0_22 = arith.constant 0 : index
    %28 = vector.load %arg9[%c0_21, %c0_22] : memref<1x128xf32, #tpu.memory_space<vmem>>, vector<1x128xf32>
    %29 = vector.broadcast %28 : vector<1x128xf32> to vector<8x128xf32>
    %30 = arith.addf %27, %29 : vector<8x128xf32>
    %31 = math.tanh %30 : vector<8x128xf32>
    %cst_23 = arith.constant 2.000000e+00 : f32
    %32 = vector.broadcast %cst_23 : f32 to vector<8x128xf32>
    %33 = arith.mulf %32, %31 : vector<8x128xf32>
    %c0_24 = arith.constant 0 : index
    %c0_25 = arith.constant 0 : index
    %34 = vector.load %arg10[%c0_24, %c0_25] : memref<8x128xf32, #tpu.memory_space<vmem>>, vector<8x128xf32>
    tpu.vector_store %arg10[%c0_24, %c0_25], %33 {strides = array<i32>} : memref<8x128xf32, #tpu.memory_space<vmem>>, vector<8x128xf32>,
    return
  }
  func.func @transform_0(%arg0: i32) -> (i32, i32) {
    %c0_i32 = arith.constant 0 : i32
    %c0_i32_0 = arith.constant 0 : i32
    return %arg0, %c0_i32 : i32, i32
  }
  func.func @transform_1(%arg0: i32) -> (i32, i32) {
    %c0_i32 = arith.constant 0 : i32
    %c0_i32_0 = arith.constant 0 : i32
    %c0_i32_1 = arith.constant 0 : i32
    return %c0_i32, %c0_i32_0 : i32, i32
  }
  func.func @transform_2(%arg0: i32) -> (i32, i32) {
    %c0_i32 = arith.constant 0 : i32
    %c0_i32_0 = arith.constant 0 : i32
    %c0_i32_1 = arith.constant 0 : i32
    return %c0_i32, %c0_i32_0 : i32, i32
  }
  func.func @transform_3(%arg0: i32) -> (i32, i32) {
    %c0_i32 = arith.constant 0 : i32
    %c0_i32_0 = arith.constant 0 : i32
    %c0_i32_1 = arith.constant 0 : i32
    return %c0_i32, %c0_i32_0 : i32, i32
  }
  func.func @transform_4(%arg0: i32) -> (i32, i32) {
    %c0_i32 = arith.constant 0 : i32
    %c0_i32_0 = arith.constant 0 : i32
    %c0_i32_1 = arith.constant 0 : i32
    return %c0_i32, %c0_i32_0 : i32, i32
  }
  func.func @transform_5(%arg0: i32) -> (i32, i32) {
    %c0_i32 = arith.constant 0 : i32
    %c0_i32_0 = arith.constant 0 : i32
    %c0_i32_1 = arith.constant 0 : i32
    return %c0_i32, %c0_i32_0 : i32, i32
  }
  func.func @transform_6(%arg0: i32) -> (i32, i32) {
    %c0_i32 = arith.constant 0 : i32
    %c0_i32_0 = arith.constant 0 : i32
    %c0_i32_1 = arith.constant 0 : i32
    return %c0_i32, %c0_i32_0 : i32, i32
  }
  func.func @transform_7(%arg0: i32) -> (i32, i32) {
    %c0_i32 = arith.constant 0 : i32
    %c0_i32_0 = arith.constant 0 : i32
    %c0_i32_1 = arith.constant 0 : i32
    return %c0_i32, %c0_i32_0 : i32, i32
  }
  func.func @transform_8(%arg0: i32) -> (i32, i32) {
    %c0_i32 = arith.constant 0 : i32
    %c0_i32_0 = arith.constant 0 : i32
    %c0_i32_1 = arith.constant 0 : i32
    return %c0_i32, %c0_i32_0 : i32, i32
  }
  func.func @transform_9(%arg0: i32) -> (i32, i32) {
    %c0_i32 = arith.constant 0 : i32
    %c0_i32_0 = arith.constant 0 : i32
    return %arg0, %c0_i32 : i32, i32
  }
}

</mosaic_0001>

<bundles_post_ra>
// kernel: tpu_custom_call.1
= control target key start
LH: loop header
LB: loop body
LE: loop exit
PB: predicated region body
PF: predicated region fallthrough
CT: control target
= control target key end

     0   :  { %14 = vsyncpa [#allocation3], 0  ;;  %s947_s0 = inlined_call_operand.hbm [shape: f32[8,16], index: 0, kind: input, shape index: {}]   ;;  %s948_s1 = inlined_call_operand.hbm [shape: bf16[16,128], index: 1, kind: input, shape index: {}]   ;;  %s949_s2 = inlined_call_operand.vmem [shape: f32[1,128], index: 2, kind: input, shape index: {}]   ;;  %s950_s3 = inlined_call_operand.hbm [shape: bf16[128,128], index: 3, kind: input, shape index: {}]   ;;  %s951_s4 = inlined_call_operand.vmem [shape: f32[1,128], index: 4, kind: input, shape index: {}]   ;;  %s952_s5 = inlined_call_operand.hbm [shape: bf16[128,128], index: 5, kind: input, shape index: {}]   ;;  %s953_s6 = inlined_call_operand.vmem [shape: f32[1,128], index: 6, kind: input, shape index: {}]   ;;  %s954_s7 = inlined_call_operand.hbm [shape: bf16[128,128], index: 7, kind: input, shape index: {}]   ;;  %s955_s8 = inlined_call_operand.vmem [shape: f32[1,128], index: 8, kind: input, shape index: {}]   ;;  %s956_s9 = inlined_call_operand.hbm [shape: f32[8,128], index: 9, kind: output, shape index: {}]  }
   0x1   :  { %15 = vsyncpa [#allocation6], 0 }
   0x2   :  { %16 = vsyncpa [#allocation9], 0 }
   0x3   :  { %17 = vsyncpa [#allocation4], 0  ;;  %s811_s30 = smov [#allocation5]  }
   0x4   :  { %s33_s10 = sshll.u32 %s811_s30, 4  ;;  %s34_s10 = int_to_ptr.vmem [resolvable:$true] %s33_s10 }
   0x5   :  { %s691_s11 = scalar_lea.vmem %s34_s10, 128  ;;  %p696_p1 = scmp.lt.s32.totalorder %s34_s10, %s34_s10 }
   0x6   :  { %p692_p0 = scmp.ne.s32.totalorder %s34_s10, %s691_s11  ;;  %p697_p2 = scmp.lt.s32.totalorder %s691_s11, %s691_s11 }
   0x8   :  { %p698_p3 = por %p697_p2, %p696_p1 }
   0xa   :  { %p699_p4 = pnand %p698_p3, %p692_p0 }
   0xc   :  { %702 = shalt.err (!%p699_p4)
}
   0xd   :  { %s812_s12 = smov 64   ;;  %s813_s13 = smov 4  }
   0xe   :  { %39 = dma.hbm_to_vmem [thread:$0]  %s948_s1, 128, %s34_s10, [#allocation6], %s812_s12, %s812_s12, %s813_s13  }
   0xf   :  { %s814_s16 = smov [#allocation8]   ;;  %s815_s18 = smov [#allocation2]  }
  0x10   :  { %s61_s17 = sshll.u32 %s814_s16, 4  ;;  %s24_s19 = sshll.u32 %s815_s18, 4  ;;  %s62_s17 = int_to_ptr.vmem [resolvable:$true] %s61_s17  ;;  %s25_s19 = int_to_ptr.vmem [resolvable:$true] %s24_s19 }
  0x11   :  { %s711_s20 = scalar_lea.vmem %s62_s17, 1024  ;;  %p716_p6 = scmp.lt.s32.totalorder %s62_s17, %s62_s17 }
  0x12   :  { %p712_p5 = scmp.ne.s32.totalorder %s62_s17, %s711_s20  ;;  %p717_p7 = scmp.lt.s32.totalorder %s711_s20, %s711_s20 }
  0x14   :  { %p718_p8 = por %p717_p7, %p716_p6 }
  0x16   :  { %p719_p9 = pnand %p718_p8, %p712_p5 }
  0x18   :  { %722 = shalt.err (!%p719_p9)
}
  0x19   :  { %67 = dma.hbm_to_vmem [thread:$0]  %s952_s5, 1024, %s62_s17, [#allocation9], %s812_s12, %s812_s12, %s813_s13  }
  0x1a   :  { %s731_s1 = scalar_lea.vmem %s25_s19, 128  ;;  %p736_p11 = scmp.lt.s32.totalorder %s25_s19, %s25_s19 }
  0x1b   :  { %p732_p10 = scmp.ne.s32.totalorder %s25_s19, %s731_s1  ;;  %p737_p12 = scmp.lt.s32.totalorder %s731_s1, %s731_s1 }
  0x1d   :  { %p738_p13 = por %p737_p12, %p736_p11 }
  0x1f   :  { %p739_p0 = pnand %p738_p13, %p732_p10 }
  0x21   :  { %742 = shalt.err (!%p739_p0)
}
  0x22   :  { %27 = dma.hbm_to_vmem [thread:$0]  %s947_s0, 128, %s25_s19, [#allocation3]  }
  0x23   :  { %s816_s25 = smov [#allocation7]   ;;  %s817_s27 = smov [#allocation10]  }
  0x24   :  { %s47_s26 = sshll.u32 %s816_s25, 4  ;;  %s75_s28 = sshll.u32 %s817_s27, 4  ;;  %s48_s26 = int_to_ptr.vmem [resolvable:$true] %s47_s26  ;;  %s76_s28 = int_to_ptr.vmem [resolvable:$true] %s75_s28 }
  0x25   :  { %s751_s29 = scalar_lea.vmem %s48_s26, 1024  ;;  %p756_p2 = scmp.lt.s32.totalorder %s48_s26, %s48_s26 }
  0x26   :  { %p752_p1 = scmp.ne.s32.totalorder %s48_s26, %s751_s29  ;;  %p757_p3 = scmp.lt.s32.totalorder %s751_s29, %s751_s29 }
  0x28   :  { %p758_p4 = por %p757_p3, %p756_p2 }
  0x2a   :  { %p759_p5 = pnand %p758_p4, %p752_p1 }
  0x2c   :  { %762 = shalt.err (!%p759_p5)
}
  0x2d   :  { %53 = dma.hbm_to_vmem [thread:$0]  %s950_s3, 1024, %s48_s26, [#allocation6], %s812_s12, %s812_s12, %s813_s13  }
  0x2e   :  { %s771_s0 = scalar_lea.vmem %s76_s28, 1024  ;;  %p776_p7 = scmp.lt.s32.totalorder %s76_s28, %s76_s28 }
  0x2f   :  { %p772_p6 = scmp.ne.s32.totalorder %s76_s28, %s771_s0  ;;  %p777_p8 = scmp.lt.s32.totalorder %s771_s0, %s771_s0 }
  0x31   :  { %p778_p9 = por %p777_p8, %p776_p7 }
  0x33   :  { %p779_p10 = pnand %p778_p9, %p772_p6 }
  0x35   :  { %782 = shalt.err (!%p779_p10)
}
  0x36   :  { %81 = dma.hbm_to_vmem [thread:$0]  %s954_s7, 1024, %s76_s28, [#allocation9], %s812_s12, %s812_s12, %s813_s13  }
  0x37   :  { %803 = dma.done.wait [#allocation3], 128  }
  0x38   :  { %804 = vsyncadd [#allocation3], 4294967168 }
  0x39   :  { %805 = dma.done.wait [#allocation6], 1152  }
  0x3a   :  { %806 = vsyncadd [#allocation6], 4294966144 }
  0x3b   :  { %807 = dma.done.wait [#allocation9], 2048  }
  0x3c   :  { %808 = vsyncadd [#allocation9], 4294965248  ;;  %v818_v0 = vmov 0.0   ;;  %vm819_vm0 = vmmov 0   ;;  %v656_v1 = vld [vmem:[#allocation5] sm:$0xff]   ;;  %v100_v2 = vld [vmem:[#allocation2] sm:$0xff] }
  0x3d   :  { %579 = vmatprep.subr.bf16.mxu0 %v818_v0  ;;  %581 = vmatprep.mubr.msk.bf16.mxu0 %vm819_vm0, %v818_v0  ;;  %v101_v3 = vpack.c.bf16 %v100_v2, %v100_v2  ;;  %vm117_vm1 = vcmask 130048   ;;  %v657_v4 = vld [vmem:[#allocation7 + $0x38] sm:$0xff]   ;;  %v658_v5 = vld [vmem:[#allocation7 + $0x30] sm:$0xff]   ;;  %v659_v6 = vld [vmem:[#allocation7 + $0x28] sm:$0xff]   ;;  %v820_v24 = vmov 0   ;;  %s821_s16 = smov [#allocation11]  }
  0x3e   :  { %585 = vmatprep.subr.bf16.mxu1 %v818_v0  ;;  %601 = vmatprep.mubr.msk.bf16.mxu1 %vm819_vm0, %v818_v0  ;;  %v660_v7 = vld [vmem:[#allocation7 + $0x20] sm:$0xff]   ;;  %v661_v8 = vld [vmem:[#allocation7 + $0x18] sm:$0xff]   ;;  %v662_v9 = vld [vmem:[#allocation7 + $0x10] sm:$0xff]  }
  0x3f   :  { %580 = vmatpush3.bf16.msra.mxu0 %v656_v1  ;;  %586 = vmatpush3.bf16.msra.mxu1 %v657_v4  ;;  %v663_v10 = vld [vmem:[#allocation7 + $0x8] sm:$0xff]   ;;  %v664_v11 = vld [vmem:[#allocation7] sm:$0xff]   ;;  %v665_v12 = vld [vmem:[#allocation8 + $0x38] sm:$0xff]  }
  0x40   :  { %605 = vmatprep.subr.bf16.mxu0 %v818_v0  ;;  %587 = vmatprep.subr.bf16.mxu1 %v818_v0  ;;  %v666_v13 = vld [vmem:[#allocation8 + $0x30] sm:$0xff]   ;;  %v667_v14 = vld [vmem:[#allocation8 + $0x28] sm:$0xff]   ;;  %v668_v15 = vld [vmem:[#allocation8 + $0x20] sm:$0xff]  }
  0x41   :  { %v669_v16 = vld [vmem:[#allocation8 + $0x18] sm:$0xff]   ;;  %v670_v17 = vld [vmem:[#allocation8 + $0x10] sm:$0xff]   ;;  %v671_v27 = vld [vmem:[#allocation8 + $0x8] sm:$0xff]  }
  0x42   :  { %582 = vmatmul.mubr.msk.bf16.vlgmr.msra.gmra.mxu0 %vm117_vm1, %v101_v3  ;;  %v520_v18 = vld [vmem:[%s949_s2] ss:$0 sm:$0xff]  ;;  %v672_v28 = vld [vmem:[#allocation8] sm:$0xff]   ;;  %v673_v29 = vld [vmem:[#allocation10 + $0x38] sm:$0xff]  }
  0x43   :  { %621 = vmatprep.mubr.msk.bf16.mxu0 %vm819_vm0, %v818_v0  ;;  %588 = vmatpush3.bf16.msra.mxu1 %v658_v5  ;;  %v674_v30 = vld [vmem:[#allocation10 + $0x30] sm:$0xff]   ;;  %v675_v31 = vld [vmem:[#allocation10 + $0x28] sm:$0xff]   ;;  %v676_v32 = vld [vmem:[#allocation10 + $0x20] sm:$0xff]  }
  0x44   :  { %589 = vmatprep.subr.bf16.mxu1 %v818_v0  ;;  %606 = vmatpush3.bf16.msra.mxu0 %v665_v12  ;;  %v677_v33 = vld [vmem:[#allocation10 + $0x18] sm:$0xff]   ;;  %v678_v34 = vld [vmem:[#allocation10 + $0x10] sm:$0xff]   ;;  %v679_v43 = vld [vmem:[#allocation10 + $0x8] sm:$0xff]  }
  0x45   :  { %607 = vmatprep.subr.bf16.mxu0 %v818_v0  ;;  %v523_v35 = vld [vmem:[%s951_s4] ss:$0 sm:$0xff]  ;;  %v680_v44 = vld [vmem:[#allocation10] sm:$0xff]  }
  0x46   :  { %v532_v45 = vld [vmem:[%s953_s6] ss:$0 sm:$0xff]  ;;  %s509_s6 = sshll.u32 %s821_s16, 4  ;;  %s510_s6 = int_to_ptr.vmem [resolvable:$true] %s509_s6 }
  0x47   :  { %590 = vmatpush3.bf16.msra.mxu1 %v659_v6  ;;  %v541_v53 = vld [vmem:[%s955_s8] ss:$0 sm:$0xff]  ;;  %s783_s17 = scalar_lea.vmem %s510_s6, 128  ;;  %p788_p12 = scmp.lt.s32.totalorder %s510_s6, %s510_s6 }
  0x48   :  { %591 = vmatprep.subr.bf16.mxu1 %v818_v0  ;;  %608 = vmatpush3.bf16.msra.mxu0 %v666_v13  ;;  %p784_p11 = scmp.ne.s32.totalorder %s510_s6, %s783_s17  ;;  %p789_p13 = scmp.lt.s32.totalorder %s783_s17, %s783_s17 }
  0x49   :  { %609 = vmatprep.subr.bf16.mxu0 %v818_v0 }
  0x4a   :  { %p790_p0 = por %p789_p13, %p788_p12 }
  0x4b   :  { %592 = vmatpush3.bf16.msra.mxu1 %v660_v7 }
  0x4c   :  { %593 = vmatprep.subr.bf16.mxu1 %v818_v0  ;;  %610 = vmatpush3.bf16.msra.mxu0 %v667_v14  ;;  %p791_p1 = pnand %p790_p0, %p784_p11 }
  0x4d   :  { %611 = vmatprep.subr.bf16.mxu0 %v818_v0 }
  0x4f   :  { %594 = vmatpush3.bf16.msra.mxu1 %v661_v8 }
  0x50   :  { %595 = vmatprep.subr.bf16.mxu1 %v818_v0  ;;  %612 = vmatpush3.bf16.msra.mxu0 %v668_v15 }
  0x51   :  { %613 = vmatprep.subr.bf16.mxu0 %v818_v0 }
  0x53   :  { %596 = vmatpush3.bf16.msra.mxu1 %v662_v9 }
  0x54   :  { %597 = vmatprep.subr.bf16.mxu1 %v818_v0  ;;  %614 = vmatpush3.bf16.msra.mxu0 %v669_v16 }
  0x55   :  { %615 = vmatprep.subr.bf16.mxu0 %v818_v0 }
  0x57   :  { %598 = vmatpush3.bf16.msra.mxu1 %v663_v10 }
  0x58   :  { %599 = vmatprep.subr.bf16.mxu1 %v818_v0  ;;  %616 = vmatpush3.bf16.msra.mxu0 %v670_v17 }
  0x59   :  { %617 = vmatprep.subr.bf16.mxu0 %v818_v0 }
  0x5b   :  { %600 = vmatpush3.bf16.msra.mxu1 %v664_v11 }
  0x5c   :  { %625 = vmatprep.subr.bf16.mxu1 %v818_v0  ;;  %618 = vmatpush3.bf16.msra.mxu0 %v671_v27 }
  0x5d   :  { %619 = vmatprep.subr.bf16.mxu0 %v818_v0 }
  0x60   :  { %620 = vmatpush3.bf16.msra.mxu0 %v672_v28 }
 0x102   :  { %v155_v19 = vpop.f32.mrf.mxu0 }
 0x103   :  { %v156_v20 = vadd.f32 %v520_v18, %v155_v19 }
 0x104   :  { %v583_v21 = vpop.f32.mrf.mxu0 }
 0x105   :  { %v161_v22 = vpack.c.bf16 %v156_v20, %v156_v20 }
 0x106   :  { %v158_v23 = vpop.f32.mrf.mxu0 }
 0x107   :  { %v162_v25 = vmax.bf16 %v820_v24, %v161_v22 }
 0x108   :  { %v584_v26 = vpop.f32.mrf.mxu0 }
 0x109   :  { %602 = vmatmul.mubr.bf16.vlgmr.msra.gmra.mxu1 %v162_v25 }
 0x10a   :  { %641 = vmatprep.mubr.msk.bf16.mxu1 %vm819_vm0, %v818_v0  ;;  %626 = vmatpush3.bf16.msra.mxu1 %v673_v29 }
 0x10b   :  { %627 = vmatprep.subr.bf16.mxu1 %v818_v0 }
 0x10e   :  { %628 = vmatpush3.bf16.msra.mxu1 %v674_v30 }
 0x10f   :  { %629 = vmatprep.subr.bf16.mxu1 %v818_v0 }
 0x112   :  { %630 = vmatpush3.bf16.msra.mxu1 %v675_v31 }
 0x113   :  { %631 = vmatprep.subr.bf16.mxu1 %v818_v0 }
 0x116   :  { %632 = vmatpush3.bf16.msra.mxu1 %v676_v32 }
 0x117   :  { %633 = vmatprep.subr.bf16.mxu1 %v818_v0 }
 0x11a   :  { %634 = vmatpush3.bf16.msra.mxu1 %v677_v33 }
 0x11b   :  { %635 = vmatprep.subr.bf16.mxu1 %v818_v0 }
 0x11e   :  { %636 = vmatpush3.bf16.msra.mxu1 %v678_v34 }
 0x11f   :  { %637 = vmatprep.subr.bf16.mxu1 %v818_v0 }
 0x122   :  { %638 = vmatpush3.bf16.msra.mxu1 %v679_v43 }
 0x123   :  { %639 = vmatprep.subr.bf16.mxu1 %v818_v0 }
 0x126   :  { %640 = vmatpush3.bf16.msra.mxu1 %v680_v44 }
 0x1c9   :  { %v268_v36 = vpop.f32.mrf.mxu1 }
 0x1ca   :  { %v269_v37 = vadd.f32 %v523_v35, %v268_v36 }
 0x1cb   :  { %v603_v38 = vpop.f32.mrf.mxu1 }
 0x1cc   :  { %v274_v39 = vpack.c.bf16 %v269_v37, %v269_v37 }
 0x1cd   :  { %v271_v40 = vpop.f32.mrf.mxu1 }
 0x1ce   :  { %v275_v41 = vmax.bf16 %v820_v24, %v274_v39 }
 0x1cf   :  { %v604_v42 = vpop.f32.mrf.mxu1 }
 0x1d0   :  { %622 = vmatmul.mubr.bf16.vlgmr.msra.gmra.mxu0 %v275_v41 }
 0x290   :  { %v381_v46 = vpop.f32.mrf.mxu0 }
 0x291   :  { %v382_v47 = vadd.f32 %v532_v45, %v381_v46 }
 0x292   :  { %v623_v48 = vpop.f32.mrf.mxu0 }
 0x293   :  { %v387_v49 = vpack.c.bf16 %v382_v47, %v382_v47 }
 0x294   :  { %v384_v50 = vpop.f32.mrf.mxu0 }
 0x295   :  { %v388_v51 = vmax.bf16 %v820_v24, %v387_v49 }
 0x296   :  { %v624_v52 = vpop.f32.mrf.mxu0 }
 0x297   :  { %642 = vmatmul.mubr.bf16.vlgmr.msra.gmra.mxu1 %v388_v51 }
 0x357   :  { %v494_v54 = vpop.f32.mrf.mxu1 }
 0x358   :  { %v495_v55 = vadd.f32 %v541_v53, %v494_v54 }
 0x359   :  { %v643_v56 = vpop.f32.mrf.mxu1 }
 0x35a   :  { %681 = vtanh.f32 %v495_v55 }
 0x35b   :  { %v497_v57 = vpop.f32.mrf.mxu1 }
 0x35d   :  { %v644_v58 = vpop.f32.mrf.mxu1 }
 0x367   :  { %v682_v59 = vpop.eup %681 }
 0x368   :  { %v501_v60 = vmul.f32 2.0, %v682_v59 }
 0x36a   :  { %502 = vst [vmem:[#allocation11] sm:$0xff] %v501_v60 }
 0x36b   :  { %794 = shalt.err (!%p791_p1)
}
 0x36c   :  { %512 = dma.vmem_to_hbm [thread:$0]  %s510_s6, 128, %s956_s9, [#allocation4]  }
 0x36d   :  { %809 = dma.done.wait [#allocation4], 128  }
 0x36e   :  { %810 = vsyncadd [#allocation4], 4294967168 }
 0x36f   :  { %516 = vsyncpa [#allocation3], 1 }
 0x370   :  { %517 = vsyncpa [#allocation6], 1 }
 0x371   :  { %518 = vsyncpa [#allocation9], 1 }
 0x372   :  { %519 = vsyncpa [#allocation4], 1 }

// kernel: tpu_custom_call.1
= control target key start
LH: loop header
LB: loop body
LE: loop exit
PB: predicated region body
PF: predicated region fallthrough
CT: control target
= control target key end

     0   :  { %14 = vsyncpa [#allocation3], 0  ;;  %s947_s0 = inlined_call_operand.hbm [shape: f32[8,16], index: 0, kind: input, shape index: {}]   ;;  %s948_s1 = inlined_call_operand.hbm [shape: bf16[16,128], index: 1, kind: input, shape index: {}]   ;;  %s949_s2 = inlined_call_operand.vmem [shape: f32[1,128], index: 2, kind: input, shape index: {}]   ;;  %s950_s3 = inlined_call_operand.hbm [shape: bf16[128,128], index: 3, kind: input, shape index: {}]   ;;  %s951_s4 = inlined_call_operand.vmem [shape: f32[1,128], index: 4, kind: input, shape index: {}]   ;;  %s952_s5 = inlined_call_operand.hbm [shape: bf16[128,128], index: 5, kind: input, shape index: {}]   ;;  %s953_s6 = inlined_call_operand.vmem [shape: f32[1,128], index: 6, kind: input, shape index: {}]   ;;  %s954_s7 = inlined_call_operand.hbm [shape: bf16[128,128], index: 7, kind: input, shape index: {}]   ;;  %s955_s8 = inlined_call_operand.vmem [shape: f32[1,128], index: 8, kind: input, shape index: {}]   ;;  %s956_s9 = inlined_call_operand.hbm [shape: f32[8,128], index: 9, kind: output, shape index: {}]  }
   0x1   :  { %15 = vsyncpa [#allocation6], 0 }
   0x2   :  { %16 = vsyncpa [#allocation9], 0 }
   0x3   :  { %17 = vsyncpa [#allocation4], 0  ;;  %s811_s30 = smov [#allocation5]  }
   0x4   :  { %s33_s10 = sshll.u32 %s811_s30, 4  ;;  %s34_s10 = int_to_ptr.vmem [resolvable:$true] %s33_s10 }
   0x5   :  { %s691_s11 = scalar_lea.vmem %s34_s10, 128  ;;  %p696_p1 = scmp.lt.s32.totalorder %s34_s10, %s34_s10 }
   0x6   :  { %p692_p0 = scmp.ne.s32.totalorder %s34_s10, %s691_s11  ;;  %p697_p2 = scmp.lt.s32.totalorder %s691_s11, %s691_s11 }
   0x8   :  { %p698_p3 = por %p697_p2, %p696_p1 }
   0xa   :  { %p699_p4 = pnand %p698_p3, %p692_p0 }
   0xc   :  { %702 = shalt.err (!%p699_p4)
}
   0xd   :  { %s812_s12 = smov 64   ;;  %s813_s13 = smov 4  }
   0xe   :  { %39 = dma.hbm_to_vmem [thread:$0]  %s948_s1, 128, %s34_s10, [#allocation6], %s812_s12, %s812_s12, %s813_s13  }
   0xf   :  { %s814_s16 = smov [#allocation8]   ;;  %s815_s18 = smov [#allocation2]  }
  0x10   :  { %s61_s17 = sshll.u32 %s814_s16, 4  ;;  %s24_s19 = sshll.u32 %s815_s18, 4  ;;  %s62_s17 = int_to_ptr.vmem [resolvable:$true] %s61_s17  ;;  %s25_s19 = int_to_ptr.vmem [resolvable:$true] %s24_s19 }
  0x11   :  { %s711_s20 = scalar_lea.vmem %s62_s17, 1024  ;;  %p716_p6 = scmp.lt.s32.totalorder %s62_s17, %s62_s17 }
  0x12   :  { %p712_p5 = scmp.ne.s32.totalorder %s62_s17, %s711_s20  ;;  %p717_p7 = scmp.lt.s32.totalorder %s711_s20, %s711_s20 }
  0x14   :  { %p718_p8 = por %p717_p7, %p716_p6 }
  0x16   :  { %p719_p9 = pnand %p718_p8, %p712_p5 }
  0x18   :  { %722 = shalt.err (!%p719_p9)
}
  0x19   :  { %67 = dma.hbm_to_vmem [thread:$0]  %s952_s5, 1024, %s62_s17, [#allocation9], %s812_s12, %s812_s12, %s813_s13  }
  0x1a   :  { %s731_s1 = scalar_lea.vmem %s25_s19, 128  ;;  %p736_p11 = scmp.lt.s32.totalorder %s25_s19, %s25_s19 }
  0x1b   :  { %p732_p10 = scmp.ne.s32.totalorder %s25_s19, %s731_s1  ;;  %p737_p12 = scmp.lt.s32.totalorder %s731_s1, %s731_s1 }
  0x1d   :  { %p738_p13 = por %p737_p12, %p736_p11 }
  0x1f   :  { %p739_p0 = pnand %p738_p13, %p732_p10 }
  0x21   :  { %742 = shalt.err (!%p739_p0)
}
  0x22   :  { %27 = dma.hbm_to_vmem [thread:$0]  %s947_s0, 128, %s25_s19, [#allocation3]  }
  0x23   :  { %s816_s25 = smov [#allocation7]   ;;  %s817_s27 = smov [#allocation10]  }
  0x24   :  { %s47_s26 = sshll.u32 %s816_s25, 4  ;;  %s75_s28 = sshll.u32 %s817_s27, 4  ;;  %s48_s26 = int_to_ptr.vmem [resolvable:$true] %s47_s26  ;;  %s76_s28 = int_to_ptr.vmem [resolvable:$true] %s75_s28 }
  0x25   :  { %s751_s29 = scalar_lea.vmem %s48_s26, 1024  ;;  %p756_p2 = scmp.lt.s32.totalorder %s48_s26, %s48_s26 }
  0x26   :  { %p752_p1 = scmp.ne.s32.totalorder %s48_s26, %s751_s29  ;;  %p757_p3 = scmp.lt.s32.totalorder %s751_s29, %s751_s29 }
  0x28   :  { %p758_p4 = por %p757_p3, %p756_p2 }
  0x2a   :  { %p759_p5 = pnand %p758_p4, %p752_p1 }
  0x2c   :  { %762 = shalt.err (!%p759_p5)
}
  0x2d   :  { %53 = dma.hbm_to_vmem [thread:$0]  %s950_s3, 1024, %s48_s26, [#allocation6], %s812_s12, %s812_s12, %s813_s13  }
  0x2e   :  { %s771_s0 = scalar_lea.vmem %s76_s28, 1024  ;;  %p776_p7 = scmp.lt.s32.totalorder %s76_s28, %s76_s28 }
  0x2f   :  { %p772_p6 = scmp.ne.s32.totalorder %s76_s28, %s771_s0  ;;  %p777_p8 = scmp.lt.s32.totalorder %s771_s0, %s771_s0 }
  0x31   :  { %p778_p9 = por %p777_p8, %p776_p7 }
  0x33   :  { %p779_p10 = pnand %p778_p9, %p772_p6 }
  0x35   :  { %782 = shalt.err (!%p779_p10)
}
  0x36   :  { %81 = dma.hbm_to_vmem [thread:$0]  %s954_s7, 1024, %s76_s28, [#allocation9], %s812_s12, %s812_s12, %s813_s13  }
  0x37   :  { %803 = dma.done.wait [#allocation3], 128  }
  0x38   :  { %804 = vsyncadd [#allocation3], 4294967168 }
  0x39   :  { %805 = dma.done.wait [#allocation6], 1152  }
  0x3a   :  { %806 = vsyncadd [#allocation6], 4294966144 }
  0x3b   :  { %807 = dma.done.wait [#allocation9], 2048  }
  0x3c   :  { %808 = vsyncadd [#allocation9], 4294965248  ;;  %v818_v0 = vmov 0.0   ;;  %vm819_vm0 = vmmov 0   ;;  %v656_v1 = vld [vmem:[#allocation5] sm:$0xff]   ;;  %v100_v2 = vld [vmem:[#allocation2] sm:$0xff] }
  0x3d   :  { %579 = vmatprep.subr.bf16.mxu0 %v818_v0  ;;  %581 = vmatprep.mubr.msk.bf16.mxu0 %vm819_vm0, %v818_v0  ;;  %v101_v3 = vpack.c.bf16 %v100_v2, %v100_v2  ;;  %vm117_vm1 = vcmask 130048   ;;  %v657_v4 = vld [vmem:[#allocation7 + $0x38] sm:$0xff]   ;;  %v658_v5 = vld [vmem:[#allocation7 + $0x30] sm:$0xff]   ;;  %v659_v6 = vld [vmem:[#allocation7 + $0x28] sm:$0xff]   ;;  %v820_v24 = vmov 0   ;;  %s821_s16 = smov [#allocation11]  }
  0x3e   :  { %585 = vmatprep.subr.bf16.mxu1 %v818_v0  ;;  %601 = vmatprep.mubr.msk.bf16.mxu1 %vm819_vm0, %v818_v0  ;;  %v660_v7 = vld [vmem:[#allocation7 + $0x20] sm:$0xff]   ;;  %v661_v8 = vld [vmem:[#allocation7 + $0x18] sm:$0xff]   ;;  %v662_v9 = vld [vmem:[#allocation7 + $0x10] sm:$0xff]  }
  0x3f   :  { %580 = vmatpush3.bf16.msra.mxu0 %v656_v1  ;;  %586 = vmatpush3.bf16.msra.mxu1 %v657_v4  ;;  %v663_v10 = vld [vmem:[#allocation7 + $0x8] sm:$0xff]   ;;  %v664_v11 = vld [vmem:[#allocation7] sm:$0xff]   ;;  %v665_v12 = vld [vmem:[#allocation8 + $0x38] sm:$0xff]  }
  0x40   :  { %605 = vmatprep.subr.bf16.mxu0 %v818_v0  ;;  %587 = vmatprep.subr.bf16.mxu1 %v818_v0  ;;  %v666_v13 = vld [vmem:[#allocation8 + $0x30] sm:$0xff]   ;;  %v667_v14 = vld [vmem:[#allocation8 + $0x28] sm:$0xff]   ;;  %v668_v15 = vld [vmem:[#allocation8 + $0x20] sm:$0xff]  }
  0x41   :  { %v669_v16 = vld [vmem:[#allocation8 + $0x18] sm:$0xff]   ;;  %v670_v17 = vld [vmem:[#allocation8 + $0x10] sm:$0xff]   ;;  %v671_v27 = vld [vmem:[#allocation8 + $0x8] sm:$0xff]  }
  0x42   :  { %582 = vmatmul.mubr.msk.bf16.vlgmr.msra.gmra.mxu0 %vm117_vm1, %v101_v3  ;;  %v520_v18 = vld [vmem:[%s949_s2] ss:$0 sm:$0xff]  ;;  %v672_v28 = vld [vmem:[#allocation8] sm:$0xff]   ;;  %v673_v29 = vld [vmem:[#allocation10 + $0x38] sm:$0xff]  }
  0x43   :  { %621 = vmatprep.mubr.msk.bf16.mxu0 %vm819_vm0, %v818_v0  ;;  %588 = vmatpush3.bf16.msra.mxu1 %v658_v5  ;;  %v674_v30 = vld [vmem:[#allocation10 + $0x30] sm:$0xff]   ;;  %v675_v31 = vld [vmem:[#allocation10 + $0x28] sm:$0xff]   ;;  %v676_v32 = vld [vmem:[#allocation10 + $0x20] sm:$0xff]  }
  0x44   :  { %589 = vmatprep.subr.bf16.mxu1 %v818_v0  ;;  %606 = vmatpush3.bf16.msra.mxu0 %v665_v12  ;;  %v677_v33 = vld [vmem:[#allocation10 + $0x18] sm:$0xff]   ;;  %v678_v34 = vld [vmem:[#allocation10 + $0x10] sm:$0xff]   ;;  %v679_v43 = vld [vmem:[#allocation10 + $0x8] sm:$0xff]  }
  0x45   :  { %607 = vmatprep.subr.bf16.mxu0 %v818_v0  ;;  %v523_v35 = vld [vmem:[%s951_s4] ss:$0 sm:$0xff]  ;;  %v680_v44 = vld [vmem:[#allocation10] sm:$0xff]  }
  0x46   :  { %v532_v45 = vld [vmem:[%s953_s6] ss:$0 sm:$0xff]  ;;  %s509_s6 = sshll.u32 %s821_s16, 4  ;;  %s510_s6 = int_to_ptr.vmem [resolvable:$true] %s509_s6 }
  0x47   :  { %590 = vmatpush3.bf16.msra.mxu1 %v659_v6  ;;  %v541_v53 = vld [vmem:[%s955_s8] ss:$0 sm:$0xff]  ;;  %s783_s17 = scalar_lea.vmem %s510_s6, 128  ;;  %p788_p12 = scmp.lt.s32.totalorder %s510_s6, %s510_s6 }
  0x48   :  { %591 = vmatprep.subr.bf16.mxu1 %v818_v0  ;;  %608 = vmatpush3.bf16.msra.mxu0 %v666_v13  ;;  %p784_p11 = scmp.ne.s32.totalorder %s510_s6, %s783_s17  ;;  %p789_p13 = scmp.lt.s32.totalorder %s783_s17, %s783_s17 }
  0x49   :  { %609 = vmatprep.subr.bf16.mxu0 %v818_v0 }
  0x4a   :  { %p790_p0 = por %p789_p13, %p788_p12 }
  0x4b   :  { %592 = vmatpush3.bf16.msra.mxu1 %v660_v7 }
  0x4c   :  { %593 = vmatprep.subr.bf16.mxu1 %v818_v0  ;;  %610 = vmatpush3.bf16.msra.mxu0 %v667_v14  ;;  %p791_p1 = pnand %p790_p0, %p784_p11 }
  0x4d   :  { %611 = vmatprep.subr.bf16.mxu0 %v818_v0 }
  0x4f   :  { %594 = vmatpush3.bf16.msra.mxu1 %v661_v8 }
  0x50   :  { %595 = vmatprep.subr.bf16.mxu1 %v818_v0  ;;  %612 = vmatpush3.bf16.msra.mxu0 %v668_v15 }
  0x51   :  { %613 = vmatprep.subr.bf16.mxu0 %v818_v0 }
  0x53   :  { %596 = vmatpush3.bf16.msra.mxu1 %v662_v9 }
  0x54   :  { %597 = vmatprep.subr.bf16.mxu1 %v818_v0  ;;  %614 = vmatpush3.bf16.msra.mxu0 %v669_v16 }
  0x55   :  { %615 = vmatprep.subr.bf16.mxu0 %v818_v0 }
  0x57   :  { %598 = vmatpush3.bf16.msra.mxu1 %v663_v10 }
  0x58   :  { %599 = vmatprep.subr.bf16.mxu1 %v818_v0  ;;  %616 = vmatpush3.bf16.msra.mxu0 %v670_v17 }
  0x59   :  { %617 = vmatprep.subr.bf16.mxu0 %v818_v0 }
  0x5b   :  { %600 = vmatpush3.bf16.msra.mxu1 %v664_v11 }
  0x5c   :  { %625 = vmatprep.subr.bf16.mxu1 %v818_v0  ;;  %618 = vmatpush3.bf16.msra.mxu0 %v671_v27 }
  0x5d   :  { %619 = vmatprep.subr.bf16.mxu0 %v818_v0 }
  0x60   :  { %620 = vmatpush3.bf16.msra.mxu0 %v672_v28 }
 0x102   :  { %v155_v19 = vpop.f32.mrf.mxu0 }
 0x103   :  { %v156_v20 = vadd.f32 %v520_v18, %v155_v19 }
 0x104   :  { %v583_v21 = vpop.f32.mrf.mxu0 }
 0x105   :  { %v161_v22 = vpack.c.bf16 %v156_v20, %v156_v20 }
 0x106   :  { %v158_v23 = vpop.f32.mrf.mxu0 }
 0x107   :  { %v162_v25 = vmax.bf16 %v820_v24, %v161_v22 }
 0x108   :  { %v584_v26 = vpop.f32.mrf.mxu0 }
 0x109   :  { %602 = vmatmul.mubr.bf16.vlgmr.msra.gmra.mxu1 %v162_v25 }
 0x10a   :  { %641 = vmatprep.mubr.msk.bf16.mxu1 %vm819_vm0, %v818_v0  ;;  %626 = vmatpush3.bf16.msra.mxu1 %v673_v29 }
 0x10b   :  { %627 = vmatprep.subr.bf16.mxu1 %v818_v0 }
 0x10e   :  { %628 = vmatpush3.bf16.msra.mxu1 %v674_v30 }
 0x10f   :  { %629 = vmatprep.subr.bf16.mxu1 %v818_v0 }
 0x112   :  { %630 = vmatpush3.bf16.msra.mxu1 %v675_v31 }
 0x113   :  { %631 = vmatprep.subr.bf16.mxu1 %v818_v0 }
 0x116   :  { %632 = vmatpush3.bf16.msra.mxu1 %v676_v32 }
 0x117   :  { %633 = vmatprep.subr.bf16.mxu1 %v818_v0 }
 0x11a   :  { %634 = vmatpush3.bf16.msra.mxu1 %v677_v33 }
 0x11b   :  { %635 = vmatprep.subr.bf16.mxu1 %v818_v0 }
 0x11e   :  { %636 = vmatpush3.bf16.msra.mxu1 %v678_v34 }
 0x11f   :  { %637 = vmatprep.subr.bf16.mxu1 %v818_v0 }
 0x122   :  { %638 = vmatpush3.bf16.msra.mxu1 %v679_v43 }
 0x123   :  { %639 = vmatprep.subr.bf16.mxu1 %v818_v0 }
 0x126   :  { %640 = vmatpush3.bf16.msra.mxu1 %v680_v44 }
 0x1c9   :  { %v268_v36 = vpop.f32.mrf.mxu1 }
 0x1ca   :  { %v269_v37 = vadd.f32 %v523_v35, %v268_v36 }
 0x1cb   :  { %v603_v38 = vpop.f32.mrf.mxu1 }
 0x1cc   :  { %v274_v39 = vpack.c.bf16 %v269_v37, %v269_v37 }
 0x1cd   :  { %v271_v40 = vpop.f32.mrf.mxu1 }
 0x1ce   :  { %v275_v41 = vmax.bf16 %v820_v24, %v274_v39 }
 0x1cf   :  { %v604_v42 = vpop.f32.mrf.mxu1 }
 0x1d0   :  { %622 = vmatmul.mubr.bf16.vlgmr.msra.gmra.mxu0 %v275_v41 }
 0x290   :  { %v381_v46 = vpop.f32.mrf.mxu0 }
 0x291   :  { %v382_v47 = vadd.f32 %v532_v45, %v381_v46 }
 0x292   :  { %v623_v48 = vpop.f32.mrf.mxu0 }
 0x293   :  { %v387_v49 = vpack.c.bf16 %v382_v47, %v382_v47 }
 0x294   :  { %v384_v50 = vpop.f32.mrf.mxu0 }
 0x295   :  { %v388_v51 = vmax.bf16 %v820_v24, %v387_v49 }
 0x296   :  { %v624_v52 = vpop.f32.mrf.mxu0 }
 0x297   :  { %642 = vmatmul.mubr.bf16.vlgmr.msra.gmra.mxu1 %v388_v51 }
 0x357   :  { %v494_v54 = vpop.f32.mrf.mxu1 }
 0x358   :  { %v495_v55 = vadd.f32 %v541_v53, %v494_v54 }
 0x359   :  { %v643_v56 = vpop.f32.mrf.mxu1 }
 0x35a   :  { %681 = vtanh.f32 %v495_v55 }
 0x35b   :  { %v497_v57 = vpop.f32.mrf.mxu1 }
 0x35d   :  { %v644_v58 = vpop.f32.mrf.mxu1 }
 0x367   :  { %v682_v59 = vpop.eup %681 }
 0x368   :  { %v501_v60 = vmul.f32 2.0, %v682_v59 }
 0x36a   :  { %502 = vst [vmem:[#allocation11] sm:$0xff] %v501_v60 }
 0x36b   :  { %794 = shalt.err (!%p791_p1)
}
 0x36c   :  { %512 = dma.vmem_to_hbm [thread:$0]  %s510_s6, 128, %s956_s9, [#allocation4]  }
 0x36d   :  { %809 = dma.done.wait [#allocation4], 128  }
 0x36e   :  { %810 = vsyncadd [#allocation4], 4294967168 }
 0x36f   :  { %516 = vsyncpa [#allocation3], 1 }
 0x370   :  { %517 = vsyncpa [#allocation6], 1 }
 0x371   :  { %518 = vsyncpa [#allocation9], 1 }
 0x372   :  { %519 = vsyncpa [#allocation4], 1 }

</bundles_post_ra>
